<compile_context>
chip_gen: v7x
topology: tpu7x:2x2x1
jax: 0.10.0
libtpu: 0.0.40
codegen_flags: <defaults>
</compile_context>

<pallas_src>
import functools

import jax
import jax.numpy as jnp
from jax.experimental import pallas as pl
from jax.experimental.pallas import tpu as pltpu


def _se_kernel(x_ref, w1_ref, w2_ref, o_ref, *, inv_hw):
    """One grid step processes TB samples.

    x_ref / o_ref : (TB, C, HW)   NCHW flattening, spatial on lanes
    w1_ref        : (C, Cr)       transpose of nn.Linear(C, Cr).weight
    w2_ref        : (Cr, C)       transpose of nn.Linear(Cr, C).weight
    """
    # Squeeze: global average pool over the spatial axis, accumulated in f32.
    pooled = jnp.sum(x_ref[...].astype(jnp.float32), axis=2) * inv_hw  # (TB, C)

    # Excitation: Linear -> ReLU -> Linear -> Sigmoid (all f32).
    h = jnp.dot(pooled, w1_ref[...], preferred_element_type=jnp.float32)  # (TB, Cr)
    h = jnp.maximum(h, 0.0)
    y = jnp.dot(h, w2_ref[...], preferred_element_type=jnp.float32)       # (TB, C)
    y = jax.nn.sigmoid(y).astype(o_ref.dtype)

    # Scale: re-read x_ref (don't keep the block live across the matmuls) and
    # broadcast the per-channel gate over the spatial (lane) axis.
    o_ref[...] = x_ref[...] * y[:, :, None]


def _tpu_hw_params():
    """(physical VMEM bytes, TensorCores per chip) with safe fallbacks."""
    vmem_cap = 64 << 20   # conservative default = v7x per-TC VMEM
    num_cores = 1
    try:
        info = pltpu.get_tpu_info()
        vmem_cap = int(getattr(info, "vmem_capacity_bytes", vmem_cap) or vmem_cap)
        num_cores = int(getattr(info, "num_cores", num_cores) or num_cores)
    except Exception:
        pass
    return vmem_cap, num_cores


def _pick_block_batch(batch, per_sample_bytes, vmem_cap_bytes, target_bytes,
                      num_cores):
    """Batch samples per grid step: as large as the DMA-amortization target and
    the VMEM budget allow (no divisor requirement; the grid is ragged)."""
    budget = int(0.70 * vmem_cap_bytes)                # headroom for weights etc.
    max_block_bytes = max(per_sample_bytes, budget // 4)   # 4 = 2 bufs in + 2 out
    block_target = min(target_bytes, max_block_bytes)
    tb = max(1, min(batch, block_target // max(per_sample_bytes, 1)))
    if num_cores >= 2 and batch >= 2:
        # Only on 2-TC chips (v7x): keep >= 2 grid steps so both cores get work.
        tb = min(tb, max(1, batch // 2))
    return int(tb)


def se_forward(x_nchw, w1_t, w2_t, *, target_block_bytes=8 << 20):
    """SE forward.  x_nchw: (B, C, H, W); w1_t: (C, C//r); w2_t: (C//r, C)."""
    B, C, H, W = x_nchw.shape
    HW = H * W
    Cr = w1_t.shape[1]
    dtype = x_nchw.dtype
    itemsize = jnp.dtype(dtype).itemsize

    x_in = x_nchw.reshape(B, C, HW)                    # free reshape, no copy

    vmem_cap, num_cores = _tpu_hw_params()
    per_sample_bytes = C * HW * itemsize
    tb = _pick_block_batch(B, per_sample_bytes, vmem_cap, target_block_bytes,
                           num_cores)
    block_bytes = tb * per_sample_bytes
    grid = (pl.cdiv(B, tb),)

    # Explicit, generation-aware VMEM budget: double-buffered in + out blocks,
    # the (tiny) resident weights, plus slack; never request more than physical.
    w_bytes = (C * Cr + Cr * C) * 4
    vmem_needed = 4 * block_bytes + 4 * w_bytes + (2 << 20)
    vmem_limit_bytes = int(min(max(vmem_needed, 32 << 20), vmem_cap))
    # TODO(synk): if a single sample (C*HW*itemsize) exceeds the per-chip VMEM
    # budget (no tb fits), split into a pool+gate kernel over HW tiles followed
    # by a scale kernel (3 HBM passes) instead of risking a VMEM OOM.

    kernel = functools.partial(_se_kernel, inv_hw=1.0 / HW)

    # Advisory: this op is mem-bound (~2 flops/byte).
    cost = pl.CostEstimate(
        flops=int(2 * B * C * HW + 4 * B * C * Cr),
        transcendentals=int(B * C),
        bytes_accessed=int(2 * B * C * HW * itemsize + w_bytes),
    )

    def _call(single_buffer_weights):
        w_kwargs = (dict(pipeline_mode=pl.Buffered(1))
                    if single_buffer_weights else {})
        grid_spec = pltpu.PrefetchScalarGridSpec(
            num_scalar_prefetch=0,
            grid=grid,
            in_specs=[
                pl.BlockSpec((tb, C, HW), lambda b: (b, 0, 0)),
                pl.BlockSpec((C, Cr), lambda b: (0, 0), **w_kwargs),
                pl.BlockSpec((Cr, C), lambda b: (0, 0), **w_kwargs),
            ],
            out_specs=pl.BlockSpec((tb, C, HW), lambda b: (b, 0, 0)),
        )
        return pl.pallas_call(
            kernel,
            out_shape=jax.ShapeDtypeStruct((B, C, HW), dtype),
            grid_spec=grid_spec,
            compiler_params=pltpu.CompilerParams(
                dimension_semantics=("parallel",),
                vmem_limit_bytes=vmem_limit_bytes),
            cost_estimate=cost,
        )(x_in, w1_t, w2_t)

    try:
        # Weights have a constant index_map -> single-buffer them (tiny VMEM win).
        out = _call(True)
    except Exception:
        # Fallback if this compiler version rejects Buffered(1).
        out = _call(False)

    return out.reshape(B, C, H, W)


def se_reference(x, w1_t, w2_t):
    pooled = jnp.mean(x.astype(jnp.float32), axis=(2, 3))       # (B, C)
    h = jnp.maximum(pooled @ w1_t, 0.0)                         # (B, Cr)
    y = jax.nn.sigmoid(h @ w2_t)                                # (B, C)
    return x.astype(jnp.float32) * y[:, :, None, None]


if __name__ == "__main__":
    key = jax.random.PRNGKey(0)

    # --- Case 1: HW multiple of 128, f32, NCHW lane-dense path -------------
    B, C, H, W = 2, 64, 16, 16
    Cr = C // 16
    kx, k1, k2, key = jax.random.split(key, 4)
    x = jax.random.normal(kx, (B, C, H, W), dtype=jnp.float32)
    # nn.Linear(channel, channel//r).weight is (Cr, C); we store its transpose
    # so the kernel computes pooled @ w1_t directly (same for the second FC).
    w1_t = jax.random.normal(k1, (C, Cr), dtype=jnp.float32) / jnp.sqrt(C)
    w2_t = jax.random.normal(k2, (Cr, C), dtype=jnp.float32) / jnp.sqrt(Cr)

    out = jax.block_until_ready(se_forward(x, w1_t, w2_t))
    ref = se_reference(x, w1_t, w2_t)
    assert out.shape == (B, C, H, W)
    assert jnp.allclose(out, ref, atol=1e-5, rtol=1e-5)

    # --- Case 2: HW % 128 != 0 and a non-divisor batch (ragged last block) --
    B2, C2, H2, W2 = 5, 128, 7, 7
    Cr2 = C2 // 16
    kx, k1, k2, key = jax.random.split(key, 4)
    x2 = jax.random.normal(kx, (B2, C2, H2, W2), dtype=jnp.float32)
    w1_t2 = jax.random.normal(k1, (C2, Cr2), dtype=jnp.float32) / jnp.sqrt(C2)
    w2_t2 = jax.random.normal(k2, (Cr2, C2), dtype=jnp.float32) / jnp.sqrt(Cr2)

    # Force a 2-sample block so the grid is ragged (cdiv(5, 2) = 3 steps).
    out2 = jax.block_until_ready(
        se_forward(x2, w1_t2, w2_t2,
                   target_block_bytes=2 * C2 * H2 * W2 * 4))
    ref2 = se_reference(x2, w1_t2, w2_t2)
    assert out2.shape == (B2, C2, H2, W2)
    assert jnp.allclose(out2, ref2, atol=1e-5, rtol=1e-5)

    # --- Case 3: bf16 I/O (halves HBM traffic; gate math still in f32) ------
    x_bf16 = x.astype(jnp.bfloat16)
    out3 = jax.block_until_ready(se_forward(x_bf16, w1_t, w2_t))
    ref3 = se_reference(x_bf16.astype(jnp.float32), w1_t, w2_t)
    assert out3.dtype == jnp.bfloat16
    assert jnp.allclose(out3.astype(jnp.float32), ref3, atol=5e-2, rtol=5e-2)

    print("KERNEL_OK")
</pallas_src>

<mosaic_0001>
module attributes {stable_mosaic.version = 11 : i64} {
  func.func @_se_kernel(%arg0: i32, %arg1: memref<2x64x256xf32, #tpu.memory_space<vmem>>, %arg2: memref<64x4xf32, #tpu.memory_space<vmem>>, %arg3: memref<4x64xf32, #tpu.memory_space<vmem>>, %arg4: memref<2x64x256xf32, #tpu.memory_space<vmem>>) attributes {dimension_semantics = [#tpu.dimension_semantics<parallel>], iteration_bounds = array<i64: 1>, scalar_prefetch = 0 : i64, scratch_operands = 0 : i64, tpu.core_type = #tpu.core_type<tc>, window_params = [{transform_indices = @transform_0, window_bounds = array<i64: 2, 64, 256>}, {pipeline_mode = #tpu.pipeline_mode<synchronous>, transform_indices = @transform_1, window_bounds = array<i64: 64, 4>}, {pipeline_mode = #tpu.pipeline_mode<synchronous>, transform_indices = @transform_2, window_bounds = array<i64: 4, 64>}, {transform_indices = @transform_3, window_bounds = array<i64: 2, 64, 256>}]} {
    %c0 = arith.constant 0 : index
    %c0_0 = arith.constant 0 : index
    %c0_1 = arith.constant 0 : index
    %0 = vector.load %arg1[%c0, %c0_0, %c0_1] : memref<2x64x256xf32, #tpu.memory_space<vmem>>, vector<2x64x256xf32>
    %cst = arith.constant dense<0.000000e+00> : vector<2x64xf32>
    %1 = vector.multi_reduction <add>, %0, %cst [2] : vector<2x64x256xf32> to vector<2x64xf32>
    %cst_2 = arith.constant 3.906250e-03 : f32
    %2 = vector.broadcast %cst_2 : f32 to vector<2x64xf32>
    %3 = arith.mulf %1, %2 : vector<2x64xf32>
    %c0_3 = arith.constant 0 : index
    %c0_4 = arith.constant 0 : index
    %4 = vector.load %arg2[%c0_3, %c0_4] : memref<64x4xf32, #tpu.memory_space<vmem>>, vector<64x4xf32>
    %cst_5 = arith.constant dense<0.000000e+00> : vector<2x4xf32>
    %5 = tpu.matmul %3, %4, %cst_5 {dimension_numbers = #tpu.dot_dimension_numbers<[1], [0], [0], [1], [0, 0, 1, 1], [], []>} : vector<2x64xf32>, vector<64x4xf32>, vector<2x4xf32> -> vector<2x4xf32>
    %cst_6 = arith.constant 0.000000e+00 : f32
    %6 = vector.broadcast %cst_6 : f32 to vector<2x4xf32>
    %7 = arith.maximumf %5, %6 : vector<2x4xf32>
    %c0_7 = arith.constant 0 : index
    %c0_8 = arith.constant 0 : index
    %8 = vector.load %arg3[%c0_7, %c0_8] : memref<4x64xf32, #tpu.memory_space<vmem>>, vector<4x64xf32>
    %cst_9 = arith.constant dense<0.000000e+00> : vector<2x64xf32>
    %9 = tpu.matmul %7, %8, %cst_9 {dimension_numbers = #tpu.dot_dimension_numbers<[1], [0], [0], [1], [0, 0, 1, 1], [], []>} : vector<2x4xf32>, vector<4x64xf32>, vector<2x64xf32> -> vector<2x64xf32>
    %10 = arith.negf %9 : vector<2x64xf32>
    %11 = math.exp %10 : vector<2x64xf32>
    %cst_10 = arith.constant 1.000000e+00 : f32
    %12 = vector.broadcast %cst_10 : f32 to vector<2x64xf32>
    %13 = arith.addf %12, %11 : vector<2x64xf32>
    %14 = arith.divf %12, %13 : vector<2x64xf32>
    %c0_11 = arith.constant 0 : index
    %c0_12 = arith.constant 0 : index
    %c0_13 = arith.constant 0 : index
    %15 = vector.load %arg1[%c0_11, %c0_12, %c0_13] : memref<2x64x256xf32, #tpu.memory_space<vmem>>, vector<2x64x256xf32>
    %16 = vector.shape_cast %14 : vector<2x64xf32> to vector<2x64x1xf32>
    %17 = vector.broadcast %16 : vector<2x64x1xf32> to vector<2x64x256xf32>
    %18 = arith.mulf %15, %17 : vector<2x64x256xf32>
    %c0_14 = arith.constant 0 : index
    %c0_15 = arith.constant 0 : index
    %c0_16 = arith.constant 0 : index
    %19 = vector.load %arg4[%c0_14, %c0_15, %c0_16] : memref<2x64x256xf32, #tpu.memory_space<vmem>>, vector<2x64x256xf32>
    tpu.vector_store %arg4[%c0_14, %c0_15, %c0_16], %18 {strides = array<i32>} : memref<2x64x256xf32, #tpu.memory_space<vmem>>, vector<2x64x256xf32>,
    return
  }
  func.func @transform_0(%arg0: i32) -> (i32, i32, i32) {
    %c0_i32 = arith.constant 0 : i32
    %c0_i32_0 = arith.constant 0 : i32
    %c0_i32_1 = arith.constant 0 : i32
    return %arg0, %c0_i32, %c0_i32_0 : i32, i32, i32
  }
  func.func @transform_1(%arg0: i32) -> (i32, i32) {
    %c0_i32 = arith.constant 0 : i32
    %c0_i32_0 = arith.constant 0 : i32
    %c0_i32_1 = arith.constant 0 : i32
    return %c0_i32, %c0_i32_0 : i32, i32
  }
  func.func @transform_2(%arg0: i32) -> (i32, i32) {
    %c0_i32 = arith.constant 0 : i32
    %c0_i32_0 = arith.constant 0 : i32
    %c0_i32_1 = arith.constant 0 : i32
    return %c0_i32, %c0_i32_0 : i32, i32
  }
  func.func @transform_3(%arg0: i32) -> (i32, i32, i32) {
    %c0_i32 = arith.constant 0 : i32
    %c0_i32_0 = arith.constant 0 : i32
    %c0_i32_1 = arith.constant 0 : i32
    return %arg0, %c0_i32, %c0_i32_0 : i32, i32, i32
  }
}

module attributes {stable_mosaic.version = 11 : i64} {
  func.func @_se_kernel(%arg0: i32, %arg1: memref<2x64x256xf32, #tpu.memory_space<vmem>>, %arg2: memref<64x4xf32, #tpu.memory_space<vmem>>, %arg3: memref<4x64xf32, #tpu.memory_space<vmem>>, %arg4: memref<2x64x256xf32, #tpu.memory_space<vmem>>) attributes {dimension_semantics = [#tpu.dimension_semantics<parallel>], iteration_bounds = array<i64: 1>, scalar_prefetch = 0 : i64, scratch_operands = 0 : i64, tpu.core_type = #tpu.core_type<tc>, window_params = [{transform_indices = @transform_0, window_bounds = array<i64: 2, 64, 256>}, {pipeline_mode = #tpu.pipeline_mode<synchronous>, transform_indices = @transform_1, window_bounds = array<i64: 64, 4>}, {pipeline_mode = #tpu.pipeline_mode<synchronous>, transform_indices = @transform_2, window_bounds = array<i64: 4, 64>}, {transform_indices = @transform_3, window_bounds = array<i64: 2, 64, 256>}]} {
    %c0 = arith.constant 0 : index
    %c0_0 = arith.constant 0 : index
    %c0_1 = arith.constant 0 : index
    %0 = vector.load %arg1[%c0, %c0_0, %c0_1] : memref<2x64x256xf32, #tpu.memory_space<vmem>>, vector<2x64x256xf32>
    %cst = arith.constant dense<0.000000e+00> : vector<2x64xf32>
    %1 = vector.multi_reduction <add>, %0, %cst [2] : vector<2x64x256xf32> to vector<2x64xf32>
    %cst_2 = arith.constant 3.906250e-03 : f32
    %2 = vector.broadcast %cst_2 : f32 to vector<2x64xf32>
    %3 = arith.mulf %1, %2 : vector<2x64xf32>
    %c0_3 = arith.constant 0 : index
    %c0_4 = arith.constant 0 : index
    %4 = vector.load %arg2[%c0_3, %c0_4] : memref<64x4xf32, #tpu.memory_space<vmem>>, vector<64x4xf32>
    %cst_5 = arith.constant dense<0.000000e+00> : vector<2x4xf32>
    %5 = tpu.matmul %3, %4, %cst_5 {dimension_numbers = #tpu.dot_dimension_numbers<[1], [0], [0], [1], [0, 0, 1, 1], [], []>} : vector<2x64xf32>, vector<64x4xf32>, vector<2x4xf32> -> vector<2x4xf32>
    %cst_6 = arith.constant 0.000000e+00 : f32
    %6 = vector.broadcast %cst_6 : f32 to vector<2x4xf32>
    %7 = arith.maximumf %5, %6 : vector<2x4xf32>
    %c0_7 = arith.constant 0 : index
    %c0_8 = arith.constant 0 : index
    %8 = vector.load %arg3[%c0_7, %c0_8] : memref<4x64xf32, #tpu.memory_space<vmem>>, vector<4x64xf32>
    %cst_9 = arith.constant dense<0.000000e+00> : vector<2x64xf32>
    %9 = tpu.matmul %7, %8, %cst_9 {dimension_numbers = #tpu.dot_dimension_numbers<[1], [0], [0], [1], [0, 0, 1, 1], [], []>} : vector<2x4xf32>, vector<4x64xf32>, vector<2x64xf32> -> vector<2x64xf32>
    %10 = arith.negf %9 : vector<2x64xf32>
    %11 = math.exp %10 : vector<2x64xf32>
    %cst_10 = arith.constant 1.000000e+00 : f32
    %12 = vector.broadcast %cst_10 : f32 to vector<2x64xf32>
    %13 = arith.addf %12, %11 : vector<2x64xf32>
    %14 = arith.divf %12, %13 : vector<2x64xf32>
    %c0_11 = arith.constant 0 : index
    %c0_12 = arith.constant 0 : index
    %c0_13 = arith.constant 0 : index
    %15 = vector.load %arg1[%c0_11, %c0_12, %c0_13] : memref<2x64x256xf32, #tpu.memory_space<vmem>>, vector<2x64x256xf32>
    %16 = vector.shape_cast %14 : vector<2x64xf32> to vector<2x64x1xf32>
    %17 = vector.broadcast %16 : vector<2x64x1xf32> to vector<2x64x256xf32>
    %18 = arith.mulf %15, %17 : vector<2x64x256xf32>
    %c0_14 = arith.constant 0 : index
    %c0_15 = arith.constant 0 : index
    %c0_16 = arith.constant 0 : index
    %19 = vector.load %arg4[%c0_14, %c0_15, %c0_16] : memref<2x64x256xf32, #tpu.memory_space<vmem>>, vector<2x64x256xf32>
    tpu.vector_store %arg4[%c0_14, %c0_15, %c0_16], %18 {strides = array<i32>} : memref<2x64x256xf32, #tpu.memory_space<vmem>>, vector<2x64x256xf32>,
    return
  }
  func.func @transform_0(%arg0: i32) -> (i32, i32, i32) {
    %c0_i32 = arith.constant 0 : i32
    %c0_i32_0 = arith.constant 0 : i32
    %c0_i32_1 = arith.constant 0 : i32
    return %arg0, %c0_i32, %c0_i32_0 : i32, i32, i32
  }
  func.func @transform_1(%arg0: i32) -> (i32, i32) {
    %c0_i32 = arith.constant 0 : i32
    %c0_i32_0 = arith.constant 0 : i32
    %c0_i32_1 = arith.constant 0 : i32
    return %c0_i32, %c0_i32_0 : i32, i32
  }
  func.func @transform_2(%arg0: i32) -> (i32, i32) {
    %c0_i32 = arith.constant 0 : i32
    %c0_i32_0 = arith.constant 0 : i32
    %c0_i32_1 = arith.constant 0 : i32
    return %c0_i32, %c0_i32_0 : i32, i32
  }
  func.func @transform_3(%arg0: i32) -> (i32, i32, i32) {
    %c0_i32 = arith.constant 0 : i32
    %c0_i32_0 = arith.constant 0 : i32
    %c0_i32_1 = arith.constant 0 : i32
    return %arg0, %c0_i32, %c0_i32_0 : i32, i32, i32
  }
}

</mosaic_0001>

<bundles_post_ra>
// kernel: tpu_custom_call.1
= control target key start
LH: loop header
LB: loop body
LE: loop exit
PB: predicated region body
PF: predicated region fallthrough
CT: control target
= control target key end

     0   :  { %8 = vsyncpa [#allocation3], 0  ;;  %s901_s0 = inlined_call_operand.hbm [shape: f32[2,64,256], index: 0, kind: input, shape index: {}]   ;;  %s902_s1 = inlined_call_operand.vmem [shape: f32[64,4], index: 1, kind: input, shape index: {}]   ;;  %s903_s2 = inlined_call_operand.vmem [shape: f32[4,64], index: 2, kind: input, shape index: {}]   ;;  %s904_s3 = inlined_call_operand.hbm [shape: f32[2,64,256], index: 3, kind: output, shape index: {}]  }
   0x1   :  { %9 = vsyncpa [#allocation4], 0  ;;  %s665_s12 = smov [#allocation2]   ;;  %s617_s16 = scalar_lea.hbm %s901_s0, 4096 }
   0x2   :  { %s15_s13 = sshll.u32 %s665_s12, 4  ;;  %p618_p0 = scmp.ne.s32.totalorder %s901_s0, %s617_s16  ;;  %s16_s13 = int_to_ptr.vmem [resolvable:$true] %s15_s13 }
   0x3   :  { %p621_p1 = scmp.lt.u32.totalorder %s617_s16, %s901_s0 }
   0x5   :  { %p623_p2 = pnand %p621_p1, %p618_p0 }
   0x7   :  { %626 = shalt.err (!%p623_p2)
}
   0x8   :  { %s627_s21 = scalar_lea.vmem %s16_s13, 4096  ;;  %p632_p4 = scmp.lt.s32.totalorder %s16_s13, %s16_s13 }
   0x9   :  { %p628_p3 = scmp.ne.s32.totalorder %s16_s13, %s627_s21  ;;  %p633_p5 = scmp.lt.s32.totalorder %s627_s21, %s627_s21 }
   0xb   :  { %p634_p6 = por %p633_p5, %p632_p4 }
   0xd   :  { %p635_p7 = pnand %p634_p6, %p628_p3 }
   0xf   :  { %638 = shalt.err (!%p635_p7)
}
  0x10   :  { %s666_s22 = smov 256   ;;  %s667_s23 = smov 16  }
  0x11   :  { %21 = dma.hbm_to_vmem [thread:$0]  %s901_s0, 4096, %s16_s13, [#allocation3], %s666_s22, %s666_s22, %s667_s23  }
  0x12   :  { %661 = dma.done.wait [#allocation3], 4096  }
  0x13   :  { %662 = vsyncadd [#allocation3], 4294963200  ;;  %v707_v0 = vld [vmem:[#allocation2 + $0x80] sm:$0xff]  ;;  %v709_v1 = vld [vmem:[#allocation2 + $0x88] sm:$0xff]  ;;  %v668_v51 = vmov 0.0|0.0   ;;  %vm669_vm0 = vmmov 0  }
  0x14   :  { %v711_v2 = vld [vmem:[#allocation2] sm:$0xff]  ;;  %v85_v3 = vadd.f32 %v709_v1, %v707_v0  ;;  %v715_v4 = vld [vmem:[#allocation2 + $0x8] sm:$0xff]  ;;  %v717_v5 = vld [vmem:[#allocation2 + $0x90] sm:$0xff]  ;;  %594 = vmatprep.subr.bf16.mxu0 %v668_v51  ;;  %v670_v61 = vmov 0.0   ;;  %vm160_vm1 = vcmask 130112   ;;  %vm167_vm2 = vcmask 195712  }
  0x15   :  { %v719_v6 = vld [vmem:[#allocation2 + $0x98] sm:$0xff]  ;;  %v61_v7 = vadd.f32 %v715_v4, %v711_v2  ;;  %v723_v8 = vld [vmem:[#allocation2 + $0x10] sm:$0xff]  ;;  %v731_v12 = vld [vmem:[#allocation2 + $0xa0] sm:$0xff]  ;;  %586 = vmatprep.mubr.msk.f32.mxu0 %vm669_vm0, %v670_v61  ;;  %589 = vmatprep.subr.mxu1 %v670_v61  ;;  %vm174_vm3 = vcmask 261312   ;;  %vm181_vm4 = vcmask 326912   ;;  %vm188_vm5 = vcmask 392512  }
  0x16   :  { %v725_v9 = vld [vmem:[#allocation2 + $0x18] sm:$0xff]  ;;  %86 = vadd.xlane.f32.xlu1 %v85_v3  ;;  %v88_v10 = vadd.f32 %v719_v6, %v717_v5  ;;  %v733_v13 = vld [vmem:[#allocation2 + $0xa8] sm:$0xff]  ;;  %v735_v14 = vld [vmem:[#allocation2 + $0x20] sm:$0xff]  ;;  %591 = vmatprep.mubr.msk.f32.mxu1 %vm669_vm0, %v670_v61  ;;  %vm195_vm6 = vcmask 458112   ;;  %vm202_vm7 = vcmask 523712   ;;  %vm243_vm8 = vcmask 1041409  }
  0x17   :  { %62 = vadd.xlane.f32.xlu0 %v61_v7  ;;  %v64_v11 = vadd.f32 %v725_v9, %v723_v8  ;;  %v737_v15 = vld [vmem:[#allocation2 + $0x28] sm:$0xff]  ;;  %v91_v16 = vadd.f32 %v733_v13, %v731_v12  ;;  %v743_v18 = vld [vmem:[#allocation2 + $0xb0] sm:$0xff]  ;;  %v745_v19 = vld [vmem:[#allocation2 + $0xb8] sm:$0xff]  ;;  %vm245_vm9 = vcmask 523264   ;;  %vm324_vm10 = vcmask 1043456  }
  0x18   :  { %v67_v17 = vadd.f32 %v737_v15, %v735_v14  ;;  %912 = vst [vmem:[#allocation8_spill] sm:$0xff] %v745_v19  ;;  %v747_v20 = vld [vmem:[#allocation2 + $0x30] sm:$0xff]  ;;  %v749_v21 = vld [vmem:[#allocation2 + $0x38] sm:$0xff]  ;;  %v94_v22 = vadd.f32 %v745_v19, %v743_v18  ;;  %v755_v24 = vld [vmem:[#allocation2 + $0xc0] sm:$0xff]  ;;  %vm320_vm11 = vcmask 31744  }
  0x19   :  { %v70_v23 = vadd.f32 %v749_v21, %v747_v20  ;;  %v757_v25 = vld [vmem:[#allocation2 + $0xc8] sm:$0xff]  ;;  %v759_v26 = vld [vmem:[#allocation2 + $0x40] sm:$0xff]  ;;  %v767_v30 = vld [vmem:[#allocation2 + $0xd0] sm:$0xff] }
  0x1a   :  { %89 = vadd.xlane.f32.xlu1 %v88_v10  ;;  %v761_v27 = vld [vmem:[#allocation2 + $0x48] sm:$0xff]  ;;  %v97_v28 = vadd.f32 %v757_v25, %v755_v24  ;;  %913 = vst [vmem:[#allocation9_spill] sm:$0xff] %v767_v30  ;;  %v769_v31 = vld [vmem:[#allocation2 + $0xd8] sm:$0xff]  ;;  %v771_v32 = vld [vmem:[#allocation2 + $0x50] sm:$0xff]  ;;  %v149_v10 = vlaneseq }
  0x1b   :  { %65 = vadd.xlane.f32.xlu0 %v64_v11  ;;  %v73_v29 = vadd.f32 %v761_v27, %v759_v26  ;;  %914 = vst [vmem:[#allocation10_spill] sm:$0xff] %v769_v31  ;;  %v773_v33 = vld [vmem:[#allocation2 + $0x58] sm:$0xff]  ;;  %v100_v34 = vadd.f32 %v769_v31, %v767_v30  ;;  %v779_v36 = vld [vmem:[#allocation2 + $0xe0] sm:$0xff]  ;;  %v781_v37 = vld [vmem:[#allocation2 + $0xe8] sm:$0xff] }
  0x1c   :  { %v76_v35 = vadd.f32 %v773_v33, %v771_v32  ;;  %915 = vst [vmem:[#allocation11_spill] sm:$0xff] %v779_v36  ;;  %916 = vst [vmem:[#allocation12_spill] sm:$0xff] %v781_v37  ;;  %v783_v38 = vld [vmem:[#allocation2 + $0x60] sm:$0xff]  ;;  %v785_v39 = vld [vmem:[#allocation2 + $0x68] sm:$0xff]  ;;  %v103_v40 = vadd.f32 %v781_v37, %v779_v36 }
  0x1d   :  { %v79_v41 = vadd.f32 %v785_v39, %v783_v38  ;;  %v791_v42 = vld [vmem:[#allocation2 + $0xf0] sm:$0xff]  ;;  %v793_v43 = vld [vmem:[#allocation2 + $0xf8] sm:$0xff]  ;;  %v125_v48 = vld [vmem:[%s902_s1] sm:$0xff] }
  0x1e   :  { %92 = vadd.xlane.f32.xlu1 %v91_v16  ;;  %917 = vst [vmem:[#allocation13_spill] sm:$0xff] %v791_v42  ;;  %918 = vst [vmem:[#allocation14_spill] sm:$0xff] %v793_v43  ;;  %v795_v44 = vld [vmem:[#allocation2 + $0x70] sm:$0xff]  ;;  %v797_v45 = vld [vmem:[#allocation2 + $0x78] sm:$0xff]  ;;  %v106_v46 = vadd.f32 %v793_v43, %v791_v42 }
  0x1f   :  { %68 = vadd.xlane.f32.xlu0 %v67_v17  ;;  %v82_v47 = vadd.f32 %v797_v45, %v795_v44  ;;  %v126_v49 = vld [vmem:[%s902_s1 + $0x8] sm:$0xff]  ;;  %v127_v52 = vld [vmem:[%s902_s1 + $0x10] sm:$0xff]  ;;  %v128_v53 = vld [vmem:[%s902_s1 + $0x18] sm:$0xff]  ;;  %v150_v17 = vand.u32 127, %v149_v10 }
  0x20   :  { %v595_v50 = vpack.c.bf16 %v126_v49, %v125_v48  ;;  %v598_v54 = vpack.c.bf16 %v128_v53, %v127_v52  ;;  %v129_v55 = vld [vmem:[%s902_s1 + $0x20] sm:$0xff]  ;;  %v130_v56 = vld [vmem:[%s902_s1 + $0x28] sm:$0xff]  ;;  %v131_v58 = vld [vmem:[%s902_s1 + $0x30] sm:$0xff] }
  0x21   :  { %v601_v57 = vpack.c.bf16 %v130_v56, %v129_v55  ;;  %v132_v59 = vld [vmem:[%s902_s1 + $0x38] sm:$0xff] }
  0x22   :  { %95 = vadd.xlane.f32.xlu1 %v94_v22  ;;  %596 = vmatpush3.bf16.msra.mxu0 %v595_v50  ;;  %v604_v60 = vpack.c.bf16 %v132_v59, %v131_v58 }
  0x23   :  { %71 = vadd.xlane.f32.xlu0 %v70_v23  ;;  %597 = vmatprep.subr.bf16.mxu0 %v668_v51  ;;  %v827_v23 = vshrl.u32 %v149_v10, 7 }
  0x26   :  { %98 = vadd.xlane.f32.xlu1 %v97_v28  ;;  %599 = vmatpush3.bf16.msra.mxu0 %v598_v54 }
  0x27   :  { %74 = vadd.xlane.f32.xlu0 %v73_v29  ;;  %600 = vmatprep.subr.bf16.mxu0 %v668_v51  ;;  %v155_v29 = vadd.s32 4294967288, %v150_v17 }
  0x29   :  { %v158_v49 = vsub.s32 %v155_v29, %v827_v23 }
  0x2a   :  { %101 = vadd.xlane.f32.xlu1 %v100_v34  ;;  %602 = vmatpush3.bf16.msra.mxu0 %v601_v57  ;;  %v162_v34 = vadd.s32 4294967280, %v150_v17 }
  0x2b   :  { %77 = vadd.xlane.f32.xlu0 %v76_v35  ;;  %603 = vmatprep.subr.bf16.mxu0 %v668_v51  ;;  %v169_v35 = vadd.s32 4294967272, %v150_v17  ;;  %v190_v51 = vadd.s32 4294967248, %v150_v17 }
  0x2c   :  { %v165_v50 = vsub.s32 %v162_v34, %v827_v23 }
  0x2d   :  { %v172_v53 = vsub.s32 %v169_v35, %v827_v23 }
  0x2e   :  { %104 = vadd.xlane.f32.xlu1 %v103_v40  ;;  %605 = vmatpush3.bf16.msra.mxu0 %v604_v60  ;;  %v176_v40 = vadd.s32 4294967264, %v150_v17 }
  0x2f   :  { %80 = vadd.xlane.f32.xlu0 %v79_v41 }
  0x30   :  { %v179_v54 = vsub.s32 %v176_v40, %v827_v23  ;;  %v197_v40 = vadd.s32 4294967240, %v150_v17 }
  0x32   :  { %107 = vadd.xlane.f32.xlu1 %v106_v46  ;;  %v183_v46 = vadd.s32 4294967256, %v150_v17 }
  0x33   :  { %83 = vadd.xlane.f32.xlu0 %v82_v47  ;;  %v153_v47 = vsub.s32 %v150_v17, %v827_v23  ;;  %v200_v17 = vsub.s32 %v197_v40, %v827_v23 }
  0x34   :  { %v186_v57 = vsub.s32 %v183_v46, %v827_v23 }
  0xa3   :  { %v87_v62 = vpop.xlane.xlu1 %86 }
  0xa4   :  { %v63_v63 = vpop.xlane.xlu0 %62  ;;  %v117_v59 = vmul.f32 0.00390625, %v87_v62 }
  0xa5   :  { %v109_v29 = vmul.f32 0.00390625, %v63_v63 }
  0xa6   :  { %v207_v37 = vrot.slane %v117_v59, %v153_v47 }
  0xa7   :  { %v90_v3 = vpop.xlane.xlu1 %89  ;;  %v154_v19 = vrot.slane %v109_v29, %v153_v47 }
  0xa8   :  { %v66_v7 = vpop.xlane.xlu0 %65  ;;  %v118_v52 = vmul.f32 0.00390625, %v90_v3  ;;  %v193_v3 = vsub.s32 %v190_v51, %v827_v23 }
  0xa9   :  { %v110_v55 = vmul.f32 0.00390625, %v66_v7 }
  0xaa   :  { %v211_v35 = vrot.slane %v118_v52, %v158_v49 }
  0xab   :  { %v93_v11 = vpop.xlane.xlu1 %92  ;;  %v159_v7 = vrot.slane %v110_v55, %v158_v49 }
  0xac   :  { %v69_v16 = vpop.xlane.xlu0 %68  ;;  %v119_v56 = vmul.f32 0.00390625, %v93_v11  ;;  %v212_v51 = vsel %vm160_vm1, %v211_v35, %v207_v37  ;;  %v319_v35 = vld [vmem:[%s903_s2] sm:$0xf]  ;;  %s671_s2 = smov [#allocation5]  }
  0xad   :  { %v111_v60 = vmul.f32 0.00390625, %v69_v16  ;;  %v161_v49 = vsel %vm160_vm1, %v159_v7, %v154_v19  ;;  %590 = vmatpush3.msk.msra.mxu1 %vm324_vm10, %v319_v35  ;;  %s543_s15 = sshll.u32 %s671_s2, 4  ;;  %s544_s15 = int_to_ptr.vmem [resolvable:$true] %s543_s15 }
  0xae   :  { %v216_v11 = vrot.slane %v119_v56, %v165_v50  ;;  %s639_s16 = scalar_lea.vmem %s544_s15, 4096  ;;  %p644_p9 = scmp.lt.s32.totalorder %s544_s15, %s544_s15 }
  0xaf   :  { %v96_v22 = vpop.xlane.xlu1 %95  ;;  %v166_v62 = vrot.slane %v111_v60, %v165_v50  ;;  %p640_p8 = scmp.ne.s32.totalorder %s544_s15, %s639_s16  ;;  %p645_p10 = scmp.lt.s32.totalorder %s639_s16, %s639_s16 }
  0xb0   :  { %v72_v28 = vpop.xlane.xlu0 %71  ;;  %v120_v61 = vmul.f32 0.00390625, %v96_v22  ;;  %v217_v55 = vsel %vm167_vm2, %v216_v11, %v212_v51 }
  0xb1   :  { %v112_v34 = vmul.f32 0.00390625, %v72_v28  ;;  %v168_v59 = vsel %vm167_vm2, %v166_v62, %v161_v49  ;;  %p646_p11 = por %p645_p10, %p644_p9 }
  0xb2   :  { %v221_v16 = vrot.slane %v120_v61, %v172_v53 }
  0xb3   :  { %v99_v41 = vpop.xlane.xlu1 %98  ;;  %v173_v63 = vrot.slane %v112_v34, %v172_v53  ;;  %p647_p12 = pnand %p646_p11, %p640_p8 }
  0xb4   :  { %v75_v48 = vpop.xlane.xlu0 %74  ;;  %v121_v43 = vmul.f32 0.00390625, %v99_v41  ;;  %v222_v47 = vsel %vm174_vm3, %v221_v16, %v217_v55 }
  0xb5   :  { %v113_v42 = vmul.f32 0.00390625, %v75_v48  ;;  %v175_v37 = vsel %vm174_vm3, %v173_v63, %v168_v59 }
  0xb6   :  { %v226_v28 = vrot.slane %v121_v43, %v179_v54 }
  0xb7   :  { %v102_v58 = vpop.xlane.xlu1 %101  ;;  %v180_v52 = vrot.slane %v113_v42, %v179_v54 }
  0xb8   :  { %v78_v10 = vpop.xlane.xlu0 %77  ;;  %v122_v31 = vmul.f32 0.00390625, %v102_v58 }
  0xb9   :  { %v114_v30 = vmul.f32 0.00390625, %v78_v10  ;;  %v182_v19 = vsel %vm181_vm4, %v180_v52, %v175_v37  ;;  %v441_v52 = vsub.s32 1, %v827_v23 }
  0xba   :  { %v231_v48 = vrot.slane %v122_v31, %v186_v57  ;;  %v227_v31 = vsel %vm181_vm4, %v226_v28, %v222_v47  ;;  %v406_v28 = vsub.s32 0, %v827_v23 }
  0xbb   :  { %v105_v46 = vpop.xlane.xlu1 %104  ;;  %v187_v56 = vrot.slane %v114_v30, %v186_v57 }
  0xbc   :  { %v123_v22 = vmul.f32 0.00390625, %v105_v46  ;;  %v81_v36 = vpop.xlane.xlu0 %80  ;;  %v232_v54 = vsel %vm188_vm5, %v231_v48, %v227_v31 }
  0xbd   :  { %v115_v41 = vmul.f32 0.00390625, %v81_v36  ;;  %v189_v57 = vsel %vm188_vm5, %v187_v56, %v182_v19 }
  0xbe   :  { %v236_v58 = vrot.slane %v123_v22, %v193_v3 }
  0xbf   :  { %v108_v50 = vpop.xlane.xlu1 %107  ;;  %v194_v53 = vrot.slane %v115_v41, %v193_v3 }
  0xc0   :  { %v124_v43 = vmul.f32 0.00390625, %v108_v50  ;;  %v84_v36 = vpop.xlane.xlu0 %83  ;;  %v237_v60 = vsel %vm195_vm6, %v236_v58, %v232_v54 }
  0xc1   :  { %v116_v42 = vmul.f32 0.00390625, %v84_v36  ;;  %v196_v10 = vsel %vm195_vm6, %v194_v53, %v189_v57 }
  0xc2   :  { %v241_v30 = vrot.slane %v124_v43, %v200_v17 }
  0xc3   :  { %v201_v61 = vrot.slane %v116_v42, %v200_v17 }
  0xc4   :  { %v242_v29 = vsel %vm202_vm7, %v241_v30, %v237_v60  ;;  %v919_v60 = vld [vmem:[#allocation8_spill] sm:$0xff] }
  0xc5   :  { %v203_v34 = vsel %vm202_vm7, %v201_v61, %v196_v10  ;;  %v920_v10 = vld [vmem:[#allocation11_spill] sm:$0xff] }
  0xc6   :  { %v244_v3 = vsel %vm243_vm8, %v242_v29, %v203_v34  ;;  %v921_v34 = vld [vmem:[#allocation12_spill] sm:$0xff] }
  0xc7   :  { %587 = vmatmul.mubr.msk.f32.vlgmr.msra.gmra.mrb[0].mxu0 %vm245_vm9, %v244_v3  ;;  %v923_v3 = vld [vmem:[#allocation10_spill] sm:$0xff] }
 0x19a   :  { %v314_v40 = vpop.f32.mrb[0].mxu0 }
 0x19b   :  { %v318_v7 = vmax.f32 %v314_v40, 0.0  ;;  %v588_v11 = vpop.f32.mrb[1].mxu0  ;;  %v924_v40 = vld [vmem:[#allocation13_spill] sm:$0xff] }
 0x19c   :  { %v925_v11 = vld [vmem:[#allocation14_spill] sm:$0xff] }
 0x19d   :  { %592 = vmatmul.mubr.msk.f32.vlgmr.msra.gmra.mrb[0].mxu1 %vm320_vm11, %v318_v7 }
 0x270   :  { %v394_v46 = vpop.f32.mrb[0].mxu1 }
 0x271   :  { %v558_v62 = vmul.f32 -1.442695, %v394_v46  ;;  %v593_v16 = vpop.f32.mrb[1].mxu1 }
 0x273   :  { %613 = vpow2.f32 %v558_v62 }
 0x27d   :  { %v614_v22 = vpop.eup %613 }
 0x27e   :  { %v401_v63 = vadd.f32 1.0, %v614_v22 }
 0x280   :  { %615 = vrcp.f32 %v401_v63 }
 0x28a   :  { %v616_v41 = vpop.eup %615 }
 0x28b   :  { %v407_v51 = vrot.slane %v616_v41, %v406_v28  ;;  %v442_v48 = vrot.slane %v616_v41, %v441_v52 }
 0x28d   :  { %413 = vbcast.lane.b32.xlu1 %v407_v51, 264  ;;  %409 = vbcast.lane.b32.xlu0 %v407_v51, 256 }
 0x291   :  { %417 = vbcast.lane.b32.xlu1 %v407_v51, 272  ;;  %425 = vbcast.lane.b32.xlu0 %v407_v51, 288 }
 0x295   :  { %421 = vbcast.lane.b32.xlu1 %v407_v51, 280  ;;  %433 = vbcast.lane.b32.xlu0 %v407_v51, 304 }
 0x299   :  { %429 = vbcast.lane.b32.xlu1 %v407_v51, 296  ;;  %444 = vbcast.lane.b32.xlu0 %v442_v48, 256 }
 0x29d   :  { %437 = vbcast.lane.b32.xlu1 %v407_v51, 312  ;;  %452 = vbcast.lane.b32.xlu0 %v442_v48, 272 }
 0x2a1   :  { %448 = vbcast.lane.b32.xlu1 %v442_v48, 264  ;;  %460 = vbcast.lane.b32.xlu0 %v442_v48, 288 }
 0x2a5   :  { %456 = vbcast.lane.b32.xlu1 %v442_v48, 280  ;;  %468 = vbcast.lane.b32.xlu0 %v442_v48, 304 }
 0x2a9   :  { %464 = vbcast.lane.b32.xlu1 %v442_v48, 296 }
 0x2ad   :  { %472 = vbcast.lane.b32.xlu1 %v442_v48, 312 }
 0x2ff   :  { %v414_v17 = vpop.permute.xlu1 %413  ;;  %v410_v49 = vpop.permute.xlu0 %409 }
 0x300   :  { %v476_v55 = vmul.f32 %v414_v17, %v723_v8  ;;  %v477_v56 = vmul.f32 %v414_v17, %v725_v9  ;;  %v474_v23 = vmul.f32 %v410_v49, %v711_v2  ;;  %v475_v58 = vmul.f32 %v410_v49, %v715_v4 }
 0x302   :  { %508 = vst [vmem:[#allocation5 + $0x10] sm:$0xff] %v476_v55  ;;  %509 = vst [vmem:[#allocation5 + $0x18] sm:$0xff] %v477_v56 }
 0x303   :  { %506 = vst [vmem:[#allocation5] sm:$0xff] %v474_v23  ;;  %507 = vst [vmem:[#allocation5 + $0x8] sm:$0xff] %v475_v58  ;;  %v418_v50 = vpop.permute.xlu1 %417  ;;  %v426_v59 = vpop.permute.xlu0 %425 }
 0x304   :  { %v478_v47 = vmul.f32 %v418_v50, %v735_v14  ;;  %v479_v53 = vmul.f32 %v418_v50, %v737_v15  ;;  %v482_v43 = vmul.f32 %v426_v59, %v759_v26  ;;  %v483_v8 = vmul.f32 %v426_v59, %v761_v27 }
 0x306   :  { %510 = vst [vmem:[#allocation5 + $0x20] sm:$0xff] %v478_v47  ;;  %511 = vst [vmem:[#allocation5 + $0x28] sm:$0xff] %v479_v53 }
 0x307   :  { %514 = vst [vmem:[#allocation5 + $0x40] sm:$0xff] %v482_v43  ;;  %515 = vst [vmem:[#allocation5 + $0x48] sm:$0xff] %v483_v8  ;;  %v422_v2 = vpop.permute.xlu1 %421  ;;  %v434_v4 = vpop.permute.xlu0 %433 }
 0x308   :  { %v480_v9 = vmul.f32 %v422_v2, %v747_v20  ;;  %v481_v36 = vmul.f32 %v422_v2, %v749_v21  ;;  %v486_v37 = vmul.f32 %v434_v4, %v783_v38  ;;  %v487_v14 = vmul.f32 %v434_v4, %v785_v39 }
 0x30a   :  { %512 = vst [vmem:[#allocation5 + $0x30] sm:$0xff] %v480_v9  ;;  %513 = vst [vmem:[#allocation5 + $0x38] sm:$0xff] %v481_v36 }
 0x30b   :  { %518 = vst [vmem:[#allocation5 + $0x60] sm:$0xff] %v486_v37  ;;  %519 = vst [vmem:[#allocation5 + $0x68] sm:$0xff] %v487_v14  ;;  %v430_v15 = vpop.permute.xlu1 %429  ;;  %v445_v26 = vpop.permute.xlu0 %444 }
 0x30c   :  { %v484_v27 = vmul.f32 %v430_v15, %v771_v32  ;;  %v485_v31 = vmul.f32 %v430_v15, %v773_v33  ;;  %v490_v42 = vmul.f32 %v445_v26, %v707_v0  ;;  %v491_v20 = vmul.f32 %v445_v26, %v709_v1 }
 0x30e   :  { %516 = vst [vmem:[#allocation5 + $0x50] sm:$0xff] %v484_v27  ;;  %517 = vst [vmem:[#allocation5 + $0x58] sm:$0xff] %v485_v31 }
 0x30f   :  { %522 = vst [vmem:[#allocation5 + $0x80] sm:$0xff] %v490_v42  ;;  %523 = vst [vmem:[#allocation5 + $0x88] sm:$0xff] %v491_v20  ;;  %v438_v21 = vpop.permute.xlu1 %437  ;;  %v453_v38 = vpop.permute.xlu0 %452 }
 0x310   :  { %v488_v39 = vmul.f32 %v438_v21, %v795_v44  ;;  %v489_v19 = vmul.f32 %v438_v21, %v797_v45  ;;  %v494_v54 = vmul.f32 %v453_v38, %v731_v12  ;;  %v495_v32 = vmul.f32 %v453_v38, %v733_v13 }
 0x312   :  { %520 = vst [vmem:[#allocation5 + $0x70] sm:$0xff] %v488_v39  ;;  %521 = vst [vmem:[#allocation5 + $0x78] sm:$0xff] %v489_v19 }
 0x313   :  { %526 = vst [vmem:[#allocation5 + $0xa0] sm:$0xff] %v494_v54  ;;  %527 = vst [vmem:[#allocation5 + $0xa8] sm:$0xff] %v495_v32  ;;  %v449_v0 = vpop.permute.xlu1 %448  ;;  %v461_v1 = vpop.permute.xlu0 %460 }
 0x314   :  { %v492_v33 = vmul.f32 %v449_v0, %v717_v5  ;;  %v493_v30 = vmul.f32 %v449_v0, %v719_v6  ;;  %v498_v57 = vmul.f32 %v461_v1, %v755_v24  ;;  %v499_v44 = vmul.f32 %v461_v1, %v757_v25  ;;  %v922_v24 = vld [vmem:[#allocation9_spill] sm:$0xff] }
 0x316   :  { %524 = vst [vmem:[#allocation5 + $0x90] sm:$0xff] %v492_v33  ;;  %525 = vst [vmem:[#allocation5 + $0x98] sm:$0xff] %v493_v30 }
 0x317   :  { %530 = vst [vmem:[#allocation5 + $0xc0] sm:$0xff] %v498_v57  ;;  %531 = vst [vmem:[#allocation5 + $0xc8] sm:$0xff] %v499_v44  ;;  %v457_v12 = vpop.permute.xlu1 %456  ;;  %v469_v13 = vpop.permute.xlu0 %468 }
 0x318   :  { %v496_v45 = vmul.f32 %v457_v12, %v743_v18  ;;  %v497_v61 = vmul.f32 %v457_v12, %v919_v60  ;;  %v502_v29 = vmul.f32 %v469_v13, %v920_v10  ;;  %v503_v5 = vmul.f32 %v469_v13, %v921_v34 }
 0x31a   :  { %528 = vst [vmem:[#allocation5 + $0xb0] sm:$0xff] %v496_v45  ;;  %529 = vst [vmem:[#allocation5 + $0xb8] sm:$0xff] %v497_v61 }
 0x31b   :  { %534 = vst [vmem:[#allocation5 + $0xe0] sm:$0xff] %v502_v29  ;;  %535 = vst [vmem:[#allocation5 + $0xe8] sm:$0xff] %v503_v5  ;;  %v465_v6 = vpop.permute.xlu1 %464 }
 0x31c   :  { %v500_v25 = vmul.f32 %v465_v6, %v922_v24  ;;  %v501_v35 = vmul.f32 %v465_v6, %v923_v3 }
 0x31e   :  { %532 = vst [vmem:[#allocation5 + $0xd0] sm:$0xff] %v500_v25  ;;  %533 = vst [vmem:[#allocation5 + $0xd8] sm:$0xff] %v501_v35 }
 0x31f   :  { %v473_v18 = vpop.permute.xlu1 %472 }
 0x320   :  { %v504_v7 = vmul.f32 %v473_v18, %v924_v40  ;;  %v505_v46 = vmul.f32 %v473_v18, %v925_v11 }
 0x322   :  { %536 = vst [vmem:[#allocation5 + $0xf0] sm:$0xff] %v504_v7  ;;  %537 = vst [vmem:[#allocation5 + $0xf8] sm:$0xff] %v505_v46 }
 0x323   :  { %650 = shalt.err (!%p647_p12)
}
 0x324   :  { %s651_s19 = scalar_lea.hbm %s904_s3, 4096 }
 0x325   :  { %p652_p13 = scmp.ne.s32.totalorder %s904_s3, %s651_s19  ;;  %p655_p0 = scmp.lt.u32.totalorder %s651_s19, %s904_s3 }
 0x327   :  { %p657_p1 = pnand %p655_p0, %p652_p13 }
 0x329   :  { %660 = shalt.err (!%p657_p1)
}
 0x32a   :  { %549 = dma.vmem_to_hbm [thread:$0]  %s544_s15, 4096, %s904_s3, [#allocation4], %s666_s22, %s666_s22, %s667_s23  }
 0x32b   :  { %663 = dma.done.wait [#allocation4], 4096  }
 0x32c   :  { %664 = vsyncadd [#allocation4], 4294963200 }
 0x32d   :  { %553 = vsyncpa [#allocation3], 1 }
 0x32e   :  { %554 = vsyncpa [#allocation4], 1 }

// kernel: tpu_custom_call.1
= control target key start
LH: loop header
LB: loop body
LE: loop exit
PB: predicated region body
PF: predicated region fallthrough
CT: control target
= control target key end

     0   :  { %8 = vsyncpa [#allocation3], 0  ;;  %s901_s0 = inlined_call_operand.hbm [shape: f32[2,64,256], index: 0, kind: input, shape index: {}]   ;;  %s902_s1 = inlined_call_operand.vmem [shape: f32[64,4], index: 1, kind: input, shape index: {}]   ;;  %s903_s2 = inlined_call_operand.vmem [shape: f32[4,64], index: 2, kind: input, shape index: {}]   ;;  %s904_s3 = inlined_call_operand.hbm [shape: f32[2,64,256], index: 3, kind: output, shape index: {}]  }
   0x1   :  { %9 = vsyncpa [#allocation4], 0  ;;  %s665_s12 = smov [#allocation2]   ;;  %s617_s16 = scalar_lea.hbm %s901_s0, 4096 }
   0x2   :  { %s15_s13 = sshll.u32 %s665_s12, 4  ;;  %p618_p0 = scmp.ne.s32.totalorder %s901_s0, %s617_s16  ;;  %s16_s13 = int_to_ptr.vmem [resolvable:$true] %s15_s13 }
   0x3   :  { %p621_p1 = scmp.lt.u32.totalorder %s617_s16, %s901_s0 }
   0x5   :  { %p623_p2 = pnand %p621_p1, %p618_p0 }
   0x7   :  { %626 = shalt.err (!%p623_p2)
}
   0x8   :  { %s627_s21 = scalar_lea.vmem %s16_s13, 4096  ;;  %p632_p4 = scmp.lt.s32.totalorder %s16_s13, %s16_s13 }
   0x9   :  { %p628_p3 = scmp.ne.s32.totalorder %s16_s13, %s627_s21  ;;  %p633_p5 = scmp.lt.s32.totalorder %s627_s21, %s627_s21 }
   0xb   :  { %p634_p6 = por %p633_p5, %p632_p4 }
   0xd   :  { %p635_p7 = pnand %p634_p6, %p628_p3 }
   0xf   :  { %638 = shalt.err (!%p635_p7)
}
  0x10   :  { %s666_s22 = smov 256   ;;  %s667_s23 = smov 16  }
  0x11   :  { %21 = dma.hbm_to_vmem [thread:$0]  %s901_s0, 4096, %s16_s13, [#allocation3], %s666_s22, %s666_s22, %s667_s23  }
  0x12   :  { %661 = dma.done.wait [#allocation3], 4096  }
  0x13   :  { %662 = vsyncadd [#allocation3], 4294963200  ;;  %v707_v0 = vld [vmem:[#allocation2 + $0x80] sm:$0xff]  ;;  %v709_v1 = vld [vmem:[#allocation2 + $0x88] sm:$0xff]  ;;  %v668_v51 = vmov 0.0|0.0   ;;  %vm669_vm0 = vmmov 0  }
  0x14   :  { %v711_v2 = vld [vmem:[#allocation2] sm:$0xff]  ;;  %v85_v3 = vadd.f32 %v709_v1, %v707_v0  ;;  %v715_v4 = vld [vmem:[#allocation2 + $0x8] sm:$0xff]  ;;  %v717_v5 = vld [vmem:[#allocation2 + $0x90] sm:$0xff]  ;;  %594 = vmatprep.subr.bf16.mxu0 %v668_v51  ;;  %v670_v61 = vmov 0.0   ;;  %vm160_vm1 = vcmask 130112   ;;  %vm167_vm2 = vcmask 195712  }
  0x15   :  { %v719_v6 = vld [vmem:[#allocation2 + $0x98] sm:$0xff]  ;;  %v61_v7 = vadd.f32 %v715_v4, %v711_v2  ;;  %v723_v8 = vld [vmem:[#allocation2 + $0x10] sm:$0xff]  ;;  %v731_v12 = vld [vmem:[#allocation2 + $0xa0] sm:$0xff]  ;;  %586 = vmatprep.mubr.msk.f32.mxu0 %vm669_vm0, %v670_v61  ;;  %589 = vmatprep.subr.mxu1 %v670_v61  ;;  %vm174_vm3 = vcmask 261312   ;;  %vm181_vm4 = vcmask 326912   ;;  %vm188_vm5 = vcmask 392512  }
  0x16   :  { %v725_v9 = vld [vmem:[#allocation2 + $0x18] sm:$0xff]  ;;  %86 = vadd.xlane.f32.xlu1 %v85_v3  ;;  %v88_v10 = vadd.f32 %v719_v6, %v717_v5  ;;  %v733_v13 = vld [vmem:[#allocation2 + $0xa8] sm:$0xff]  ;;  %v735_v14 = vld [vmem:[#allocation2 + $0x20] sm:$0xff]  ;;  %591 = vmatprep.mubr.msk.f32.mxu1 %vm669_vm0, %v670_v61  ;;  %vm195_vm6 = vcmask 458112   ;;  %vm202_vm7 = vcmask 523712   ;;  %vm243_vm8 = vcmask 1041409  }
  0x17   :  { %62 = vadd.xlane.f32.xlu0 %v61_v7  ;;  %v64_v11 = vadd.f32 %v725_v9, %v723_v8  ;;  %v737_v15 = vld [vmem:[#allocation2 + $0x28] sm:$0xff]  ;;  %v91_v16 = vadd.f32 %v733_v13, %v731_v12  ;;  %v743_v18 = vld [vmem:[#allocation2 + $0xb0] sm:$0xff]  ;;  %v745_v19 = vld [vmem:[#allocation2 + $0xb8] sm:$0xff]  ;;  %vm245_vm9 = vcmask 523264   ;;  %vm324_vm10 = vcmask 1043456  }
  0x18   :  { %v67_v17 = vadd.f32 %v737_v15, %v735_v14  ;;  %912 = vst [vmem:[#allocation8_spill] sm:$0xff] %v745_v19  ;;  %v747_v20 = vld [vmem:[#allocation2 + $0x30] sm:$0xff]  ;;  %v749_v21 = vld [vmem:[#allocation2 + $0x38] sm:$0xff]  ;;  %v94_v22 = vadd.f32 %v745_v19, %v743_v18  ;;  %v755_v24 = vld [vmem:[#allocation2 + $0xc0] sm:$0xff]  ;;  %vm320_vm11 = vcmask 31744  }
  0x19   :  { %v70_v23 = vadd.f32 %v749_v21, %v747_v20  ;;  %v757_v25 = vld [vmem:[#allocation2 + $0xc8] sm:$0xff]  ;;  %v759_v26 = vld [vmem:[#allocation2 + $0x40] sm:$0xff]  ;;  %v767_v30 = vld [vmem:[#allocation2 + $0xd0] sm:$0xff] }
  0x1a   :  { %89 = vadd.xlane.f32.xlu1 %v88_v10  ;;  %v761_v27 = vld [vmem:[#allocation2 + $0x48] sm:$0xff]  ;;  %v97_v28 = vadd.f32 %v757_v25, %v755_v24  ;;  %913 = vst [vmem:[#allocation9_spill] sm:$0xff] %v767_v30  ;;  %v769_v31 = vld [vmem:[#allocation2 + $0xd8] sm:$0xff]  ;;  %v771_v32 = vld [vmem:[#allocation2 + $0x50] sm:$0xff]  ;;  %v149_v10 = vlaneseq }
  0x1b   :  { %65 = vadd.xlane.f32.xlu0 %v64_v11  ;;  %v73_v29 = vadd.f32 %v761_v27, %v759_v26  ;;  %914 = vst [vmem:[#allocation10_spill] sm:$0xff] %v769_v31  ;;  %v773_v33 = vld [vmem:[#allocation2 + $0x58] sm:$0xff]  ;;  %v100_v34 = vadd.f32 %v769_v31, %v767_v30  ;;  %v779_v36 = vld [vmem:[#allocation2 + $0xe0] sm:$0xff]  ;;  %v781_v37 = vld [vmem:[#allocation2 + $0xe8] sm:$0xff] }
  0x1c   :  { %v76_v35 = vadd.f32 %v773_v33, %v771_v32  ;;  %915 = vst [vmem:[#allocation11_spill] sm:$0xff] %v779_v36  ;;  %916 = vst [vmem:[#allocation12_spill] sm:$0xff] %v781_v37  ;;  %v783_v38 = vld [vmem:[#allocation2 + $0x60] sm:$0xff]  ;;  %v785_v39 = vld [vmem:[#allocation2 + $0x68] sm:$0xff]  ;;  %v103_v40 = vadd.f32 %v781_v37, %v779_v36 }
  0x1d   :  { %v79_v41 = vadd.f32 %v785_v39, %v783_v38  ;;  %v791_v42 = vld [vmem:[#allocation2 + $0xf0] sm:$0xff]  ;;  %v793_v43 = vld [vmem:[#allocation2 + $0xf8] sm:$0xff]  ;;  %v125_v48 = vld [vmem:[%s902_s1] sm:$0xff] }
  0x1e   :  { %92 = vadd.xlane.f32.xlu1 %v91_v16  ;;  %917 = vst [vmem:[#allocation13_spill] sm:$0xff] %v791_v42  ;;  %918 = vst [vmem:[#allocation14_spill] sm:$0xff] %v793_v43  ;;  %v795_v44 = vld [vmem:[#allocation2 + $0x70] sm:$0xff]  ;;  %v797_v45 = vld [vmem:[#allocation2 + $0x78] sm:$0xff]  ;;  %v106_v46 = vadd.f32 %v793_v43, %v791_v42 }
  0x1f   :  { %68 = vadd.xlane.f32.xlu0 %v67_v17  ;;  %v82_v47 = vadd.f32 %v797_v45, %v795_v44  ;;  %v126_v49 = vld [vmem:[%s902_s1 + $0x8] sm:$0xff]  ;;  %v127_v52 = vld [vmem:[%s902_s1 + $0x10] sm:$0xff]  ;;  %v128_v53 = vld [vmem:[%s902_s1 + $0x18] sm:$0xff]  ;;  %v150_v17 = vand.u32 127, %v149_v10 }
  0x20   :  { %v595_v50 = vpack.c.bf16 %v126_v49, %v125_v48  ;;  %v598_v54 = vpack.c.bf16 %v128_v53, %v127_v52  ;;  %v129_v55 = vld [vmem:[%s902_s1 + $0x20] sm:$0xff]  ;;  %v130_v56 = vld [vmem:[%s902_s1 + $0x28] sm:$0xff]  ;;  %v131_v58 = vld [vmem:[%s902_s1 + $0x30] sm:$0xff] }
  0x21   :  { %v601_v57 = vpack.c.bf16 %v130_v56, %v129_v55  ;;  %v132_v59 = vld [vmem:[%s902_s1 + $0x38] sm:$0xff] }
  0x22   :  { %95 = vadd.xlane.f32.xlu1 %v94_v22  ;;  %596 = vmatpush3.bf16.msra.mxu0 %v595_v50  ;;  %v604_v60 = vpack.c.bf16 %v132_v59, %v131_v58 }
  0x23   :  { %71 = vadd.xlane.f32.xlu0 %v70_v23  ;;  %597 = vmatprep.subr.bf16.mxu0 %v668_v51  ;;  %v827_v23 = vshrl.u32 %v149_v10, 7 }
  0x26   :  { %98 = vadd.xlane.f32.xlu1 %v97_v28  ;;  %599 = vmatpush3.bf16.msra.mxu0 %v598_v54 }
  0x27   :  { %74 = vadd.xlane.f32.xlu0 %v73_v29  ;;  %600 = vmatprep.subr.bf16.mxu0 %v668_v51  ;;  %v155_v29 = vadd.s32 4294967288, %v150_v17 }
  0x29   :  { %v158_v49 = vsub.s32 %v155_v29, %v827_v23 }
  0x2a   :  { %101 = vadd.xlane.f32.xlu1 %v100_v34  ;;  %602 = vmatpush3.bf16.msra.mxu0 %v601_v57  ;;  %v162_v34 = vadd.s32 4294967280, %v150_v17 }
  0x2b   :  { %77 = vadd.xlane.f32.xlu0 %v76_v35  ;;  %603 = vmatprep.subr.bf16.mxu0 %v668_v51  ;;  %v169_v35 = vadd.s32 4294967272, %v150_v17  ;;  %v190_v51 = vadd.s32 4294967248, %v150_v17 }
  0x2c   :  { %v165_v50 = vsub.s32 %v162_v34, %v827_v23 }
  0x2d   :  { %v172_v53 = vsub.s32 %v169_v35, %v827_v23 }
  0x2e   :  { %104 = vadd.xlane.f32.xlu1 %v103_v40  ;;  %605 = vmatpush3.bf16.msra.mxu0 %v604_v60  ;;  %v176_v40 = vadd.s32 4294967264, %v150_v17 }
  0x2f   :  { %80 = vadd.xlane.f32.xlu0 %v79_v41 }
  0x30   :  { %v179_v54 = vsub.s32 %v176_v40, %v827_v23  ;;  %v197_v40 = vadd.s32 4294967240, %v150_v17 }
  0x32   :  { %107 = vadd.xlane.f32.xlu1 %v106_v46  ;;  %v183_v46 = vadd.s32 4294967256, %v150_v17 }
  0x33   :  { %83 = vadd.xlane.f32.xlu0 %v82_v47  ;;  %v153_v47 = vsub.s32 %v150_v17, %v827_v23  ;;  %v200_v17 = vsub.s32 %v197_v40, %v827_v23 }
  0x34   :  { %v186_v57 = vsub.s32 %v183_v46, %v827_v23 }
  0xa3   :  { %v87_v62 = vpop.xlane.xlu1 %86 }
  0xa4   :  { %v63_v63 = vpop.xlane.xlu0 %62  ;;  %v117_v59 = vmul.f32 0.00390625, %v87_v62 }
  0xa5   :  { %v109_v29 = vmul.f32 0.00390625, %v63_v63 }
  0xa6   :  { %v207_v37 = vrot.slane %v117_v59, %v153_v47 }
  0xa7   :  { %v90_v3 = vpop.xlane.xlu1 %89  ;;  %v154_v19 = vrot.slane %v109_v29, %v153_v47 }
  0xa8   :  { %v66_v7 = vpop.xlane.xlu0 %65  ;;  %v118_v52 = vmul.f32 0.00390625, %v90_v3  ;;  %v193_v3 = vsub.s32 %v190_v51, %v827_v23 }
  0xa9   :  { %v110_v55 = vmul.f32 0.00390625, %v66_v7 }
  0xaa   :  { %v211_v35 = vrot.slane %v118_v52, %v158_v49 }
  0xab   :  { %v93_v11 = vpop.xlane.xlu1 %92  ;;  %v159_v7 = vrot.slane %v110_v55, %v158_v49 }
  0xac   :  { %v69_v16 = vpop.xlane.xlu0 %68  ;;  %v119_v56 = vmul.f32 0.00390625, %v93_v11  ;;  %v212_v51 = vsel %vm160_vm1, %v211_v35, %v207_v37  ;;  %v319_v35 = vld [vmem:[%s903_s2] sm:$0xf]  ;;  %s671_s2 = smov [#allocation5]  }
  0xad   :  { %v111_v60 = vmul.f32 0.00390625, %v69_v16  ;;  %v161_v49 = vsel %vm160_vm1, %v159_v7, %v154_v19  ;;  %590 = vmatpush3.msk.msra.mxu1 %vm324_vm10, %v319_v35  ;;  %s543_s15 = sshll.u32 %s671_s2, 4  ;;  %s544_s15 = int_to_ptr.vmem [resolvable:$true] %s543_s15 }
  0xae   :  { %v216_v11 = vrot.slane %v119_v56, %v165_v50  ;;  %s639_s16 = scalar_lea.vmem %s544_s15, 4096  ;;  %p644_p9 = scmp.lt.s32.totalorder %s544_s15, %s544_s15 }
  0xaf   :  { %v96_v22 = vpop.xlane.xlu1 %95  ;;  %v166_v62 = vrot.slane %v111_v60, %v165_v50  ;;  %p640_p8 = scmp.ne.s32.totalorder %s544_s15, %s639_s16  ;;  %p645_p10 = scmp.lt.s32.totalorder %s639_s16, %s639_s16 }
  0xb0   :  { %v72_v28 = vpop.xlane.xlu0 %71  ;;  %v120_v61 = vmul.f32 0.00390625, %v96_v22  ;;  %v217_v55 = vsel %vm167_vm2, %v216_v11, %v212_v51 }
  0xb1   :  { %v112_v34 = vmul.f32 0.00390625, %v72_v28  ;;  %v168_v59 = vsel %vm167_vm2, %v166_v62, %v161_v49  ;;  %p646_p11 = por %p645_p10, %p644_p9 }
  0xb2   :  { %v221_v16 = vrot.slane %v120_v61, %v172_v53 }
  0xb3   :  { %v99_v41 = vpop.xlane.xlu1 %98  ;;  %v173_v63 = vrot.slane %v112_v34, %v172_v53  ;;  %p647_p12 = pnand %p646_p11, %p640_p8 }
  0xb4   :  { %v75_v48 = vpop.xlane.xlu0 %74  ;;  %v121_v43 = vmul.f32 0.00390625, %v99_v41  ;;  %v222_v47 = vsel %vm174_vm3, %v221_v16, %v217_v55 }
  0xb5   :  { %v113_v42 = vmul.f32 0.00390625, %v75_v48  ;;  %v175_v37 = vsel %vm174_vm3, %v173_v63, %v168_v59 }
  0xb6   :  { %v226_v28 = vrot.slane %v121_v43, %v179_v54 }
  0xb7   :  { %v102_v58 = vpop.xlane.xlu1 %101  ;;  %v180_v52 = vrot.slane %v113_v42, %v179_v54 }
  0xb8   :  { %v78_v10 = vpop.xlane.xlu0 %77  ;;  %v122_v31 = vmul.f32 0.00390625, %v102_v58 }
  0xb9   :  { %v114_v30 = vmul.f32 0.00390625, %v78_v10  ;;  %v182_v19 = vsel %vm181_vm4, %v180_v52, %v175_v37  ;;  %v441_v52 = vsub.s32 1, %v827_v23 }
  0xba   :  { %v231_v48 = vrot.slane %v122_v31, %v186_v57  ;;  %v227_v31 = vsel %vm181_vm4, %v226_v28, %v222_v47  ;;  %v406_v28 = vsub.s32 0, %v827_v23 }
  0xbb   :  { %v105_v46 = vpop.xlane.xlu1 %104  ;;  %v187_v56 = vrot.slane %v114_v30, %v186_v57 }
  0xbc   :  { %v123_v22 = vmul.f32 0.00390625, %v105_v46  ;;  %v81_v36 = vpop.xlane.xlu0 %80  ;;  %v232_v54 = vsel %vm188_vm5, %v231_v48, %v227_v31 }
  0xbd   :  { %v115_v41 = vmul.f32 0.00390625, %v81_v36  ;;  %v189_v57 = vsel %vm188_vm5, %v187_v56, %v182_v19 }
  0xbe   :  { %v236_v58 = vrot.slane %v123_v22, %v193_v3 }
  0xbf   :  { %v108_v50 = vpop.xlane.xlu1 %107  ;;  %v194_v53 = vrot.slane %v115_v41, %v193_v3 }
  0xc0   :  { %v124_v43 = vmul.f32 0.00390625, %v108_v50  ;;  %v84_v36 = vpop.xlane.xlu0 %83  ;;  %v237_v60 = vsel %vm195_vm6, %v236_v58, %v232_v54 }
  0xc1   :  { %v116_v42 = vmul.f32 0.00390625, %v84_v36  ;;  %v196_v10 = vsel %vm195_vm6, %v194_v53, %v189_v57 }
  0xc2   :  { %v241_v30 = vrot.slane %v124_v43, %v200_v17 }
  0xc3   :  { %v201_v61 = vrot.slane %v116_v42, %v200_v17 }
  0xc4   :  { %v242_v29 = vsel %vm202_vm7, %v241_v30, %v237_v60  ;;  %v919_v60 = vld [vmem:[#allocation8_spill] sm:$0xff] }
  0xc5   :  { %v203_v34 = vsel %vm202_vm7, %v201_v61, %v196_v10  ;;  %v920_v10 = vld [vmem:[#allocation11_spill] sm:$0xff] }
  0xc6   :  { %v244_v3 = vsel %vm243_vm8, %v242_v29, %v203_v34  ;;  %v921_v34 = vld [vmem:[#allocation12_spill] sm:$0xff] }
  0xc7   :  { %587 = vmatmul.mubr.msk.f32.vlgmr.msra.gmra.mrb[0].mxu0 %vm245_vm9, %v244_v3  ;;  %v923_v3 = vld [vmem:[#allocation10_spill] sm:$0xff] }
 0x19a   :  { %v314_v40 = vpop.f32.mrb[0].mxu0 }
 0x19b   :  { %v318_v7 = vmax.f32 %v314_v40, 0.0  ;;  %v588_v11 = vpop.f32.mrb[1].mxu0  ;;  %v924_v40 = vld [vmem:[#allocation13_spill] sm:$0xff] }
 0x19c   :  { %v925_v11 = vld [vmem:[#allocation14_spill] sm:$0xff] }
 0x19d   :  { %592 = vmatmul.mubr.msk.f32.vlgmr.msra.gmra.mrb[0].mxu1 %vm320_vm11, %v318_v7 }
 0x270   :  { %v394_v46 = vpop.f32.mrb[0].mxu1 }
 0x271   :  { %v558_v62 = vmul.f32 -1.442695, %v394_v46  ;;  %v593_v16 = vpop.f32.mrb[1].mxu1 }
 0x273   :  { %613 = vpow2.f32 %v558_v62 }
 0x27d   :  { %v614_v22 = vpop.eup %613 }
 0x27e   :  { %v401_v63 = vadd.f32 1.0, %v614_v22 }
 0x280   :  { %615 = vrcp.f32 %v401_v63 }
 0x28a   :  { %v616_v41 = vpop.eup %615 }
 0x28b   :  { %v407_v51 = vrot.slane %v616_v41, %v406_v28  ;;  %v442_v48 = vrot.slane %v616_v41, %v441_v52 }
 0x28d   :  { %413 = vbcast.lane.b32.xlu1 %v407_v51, 264  ;;  %409 = vbcast.lane.b32.xlu0 %v407_v51, 256 }
 0x291   :  { %417 = vbcast.lane.b32.xlu1 %v407_v51, 272  ;;  %425 = vbcast.lane.b32.xlu0 %v407_v51, 288 }
 0x295   :  { %421 = vbcast.lane.b32.xlu1 %v407_v51, 280  ;;  %433 = vbcast.lane.b32.xlu0 %v407_v51, 304 }
 0x299   :  { %429 = vbcast.lane.b32.xlu1 %v407_v51, 296  ;;  %444 = vbcast.lane.b32.xlu0 %v442_v48, 256 }
 0x29d   :  { %437 = vbcast.lane.b32.xlu1 %v407_v51, 312  ;;  %452 = vbcast.lane.b32.xlu0 %v442_v48, 272 }
 0x2a1   :  { %448 = vbcast.lane.b32.xlu1 %v442_v48, 264  ;;  %460 = vbcast.lane.b32.xlu0 %v442_v48, 288 }
 0x2a5   :  { %456 = vbcast.lane.b32.xlu1 %v442_v48, 280  ;;  %468 = vbcast.lane.b32.xlu0 %v442_v48, 304 }
 0x2a9   :  { %464 = vbcast.lane.b32.xlu1 %v442_v48, 296 }
 0x2ad   :  { %472 = vbcast.lane.b32.xlu1 %v442_v48, 312 }
 0x2ff   :  { %v414_v17 = vpop.permute.xlu1 %413  ;;  %v410_v49 = vpop.permute.xlu0 %409 }
 0x300   :  { %v476_v55 = vmul.f32 %v414_v17, %v723_v8  ;;  %v477_v56 = vmul.f32 %v414_v17, %v725_v9  ;;  %v474_v23 = vmul.f32 %v410_v49, %v711_v2  ;;  %v475_v58 = vmul.f32 %v410_v49, %v715_v4 }
 0x302   :  { %508 = vst [vmem:[#allocation5 + $0x10] sm:$0xff] %v476_v55  ;;  %509 = vst [vmem:[#allocation5 + $0x18] sm:$0xff] %v477_v56 }
 0x303   :  { %506 = vst [vmem:[#allocation5] sm:$0xff] %v474_v23  ;;  %507 = vst [vmem:[#allocation5 + $0x8] sm:$0xff] %v475_v58  ;;  %v418_v50 = vpop.permute.xlu1 %417  ;;  %v426_v59 = vpop.permute.xlu0 %425 }
 0x304   :  { %v478_v47 = vmul.f32 %v418_v50, %v735_v14  ;;  %v479_v53 = vmul.f32 %v418_v50, %v737_v15  ;;  %v482_v43 = vmul.f32 %v426_v59, %v759_v26  ;;  %v483_v8 = vmul.f32 %v426_v59, %v761_v27 }
 0x306   :  { %510 = vst [vmem:[#allocation5 + $0x20] sm:$0xff] %v478_v47  ;;  %511 = vst [vmem:[#allocation5 + $0x28] sm:$0xff] %v479_v53 }
 0x307   :  { %514 = vst [vmem:[#allocation5 + $0x40] sm:$0xff] %v482_v43  ;;  %515 = vst [vmem:[#allocation5 + $0x48] sm:$0xff] %v483_v8  ;;  %v422_v2 = vpop.permute.xlu1 %421  ;;  %v434_v4 = vpop.permute.xlu0 %433 }
 0x308   :  { %v480_v9 = vmul.f32 %v422_v2, %v747_v20  ;;  %v481_v36 = vmul.f32 %v422_v2, %v749_v21  ;;  %v486_v37 = vmul.f32 %v434_v4, %v783_v38  ;;  %v487_v14 = vmul.f32 %v434_v4, %v785_v39 }
 0x30a   :  { %512 = vst [vmem:[#allocation5 + $0x30] sm:$0xff] %v480_v9  ;;  %513 = vst [vmem:[#allocation5 + $0x38] sm:$0xff] %v481_v36 }
 0x30b   :  { %518 = vst [vmem:[#allocation5 + $0x60] sm:$0xff] %v486_v37  ;;  %519 = vst [vmem:[#allocation5 + $0x68] sm:$0xff] %v487_v14  ;;  %v430_v15 = vpop.permute.xlu1 %429  ;;  %v445_v26 = vpop.permute.xlu0 %444 }
 0x30c   :  { %v484_v27 = vmul.f32 %v430_v15, %v771_v32  ;;  %v485_v31 = vmul.f32 %v430_v15, %v773_v33  ;;  %v490_v42 = vmul.f32 %v445_v26, %v707_v0  ;;  %v491_v20 = vmul.f32 %v445_v26, %v709_v1 }
 0x30e   :  { %516 = vst [vmem:[#allocation5 + $0x50] sm:$0xff] %v484_v27  ;;  %517 = vst [vmem:[#allocation5 + $0x58] sm:$0xff] %v485_v31 }
 0x30f   :  { %522 = vst [vmem:[#allocation5 + $0x80] sm:$0xff] %v490_v42  ;;  %523 = vst [vmem:[#allocation5 + $0x88] sm:$0xff] %v491_v20  ;;  %v438_v21 = vpop.permute.xlu1 %437  ;;  %v453_v38 = vpop.permute.xlu0 %452 }
 0x310   :  { %v488_v39 = vmul.f32 %v438_v21, %v795_v44  ;;  %v489_v19 = vmul.f32 %v438_v21, %v797_v45  ;;  %v494_v54 = vmul.f32 %v453_v38, %v731_v12  ;;  %v495_v32 = vmul.f32 %v453_v38, %v733_v13 }
 0x312   :  { %520 = vst [vmem:[#allocation5 + $0x70] sm:$0xff] %v488_v39  ;;  %521 = vst [vmem:[#allocation5 + $0x78] sm:$0xff] %v489_v19 }
 0x313   :  { %526 = vst [vmem:[#allocation5 + $0xa0] sm:$0xff] %v494_v54  ;;  %527 = vst [vmem:[#allocation5 + $0xa8] sm:$0xff] %v495_v32  ;;  %v449_v0 = vpop.permute.xlu1 %448  ;;  %v461_v1 = vpop.permute.xlu0 %460 }
 0x314   :  { %v492_v33 = vmul.f32 %v449_v0, %v717_v5  ;;  %v493_v30 = vmul.f32 %v449_v0, %v719_v6  ;;  %v498_v57 = vmul.f32 %v461_v1, %v755_v24  ;;  %v499_v44 = vmul.f32 %v461_v1, %v757_v25  ;;  %v922_v24 = vld [vmem:[#allocation9_spill] sm:$0xff] }
 0x316   :  { %524 = vst [vmem:[#allocation5 + $0x90] sm:$0xff] %v492_v33  ;;  %525 = vst [vmem:[#allocation5 + $0x98] sm:$0xff] %v493_v30 }
 0x317   :  { %530 = vst [vmem:[#allocation5 + $0xc0] sm:$0xff] %v498_v57  ;;  %531 = vst [vmem:[#allocation5 + $0xc8] sm:$0xff] %v499_v44  ;;  %v457_v12 = vpop.permute.xlu1 %456  ;;  %v469_v13 = vpop.permute.xlu0 %468 }
 0x318   :  { %v496_v45 = vmul.f32 %v457_v12, %v743_v18  ;;  %v497_v61 = vmul.f32 %v457_v12, %v919_v60  ;;  %v502_v29 = vmul.f32 %v469_v13, %v920_v10  ;;  %v503_v5 = vmul.f32 %v469_v13, %v921_v34 }
 0x31a   :  { %528 = vst [vmem:[#allocation5 + $0xb0] sm:$0xff] %v496_v45  ;;  %529 = vst [vmem:[#allocation5 + $0xb8] sm:$0xff] %v497_v61 }
 0x31b   :  { %534 = vst [vmem:[#allocation5 + $0xe0] sm:$0xff] %v502_v29  ;;  %535 = vst [vmem:[#allocation5 + $0xe8] sm:$0xff] %v503_v5  ;;  %v465_v6 = vpop.permute.xlu1 %464 }
 0x31c   :  { %v500_v25 = vmul.f32 %v465_v6, %v922_v24  ;;  %v501_v35 = vmul.f32 %v465_v6, %v923_v3 }
 0x31e   :  { %532 = vst [vmem:[#allocation5 + $0xd0] sm:$0xff] %v500_v25  ;;  %533 = vst [vmem:[#allocation5 + $0xd8] sm:$0xff] %v501_v35 }
 0x31f   :  { %v473_v18 = vpop.permute.xlu1 %472 }
 0x320   :  { %v504_v7 = vmul.f32 %v473_v18, %v924_v40  ;;  %v505_v46 = vmul.f32 %v473_v18, %v925_v11 }
 0x322   :  { %536 = vst [vmem:[#allocation5 + $0xf0] sm:$0xff] %v504_v7  ;;  %537 = vst [vmem:[#allocation5 + $0xf8] sm:$0xff] %v505_v46 }
 0x323   :  { %650 = shalt.err (!%p647_p12)
}
 0x324   :  { %s651_s19 = scalar_lea.hbm %s904_s3, 4096 }
 0x325   :  { %p652_p13 = scmp.ne.s32.totalorder %s904_s3, %s651_s19  ;;  %p655_p0 = scmp.lt.u32.totalorder %s651_s19, %s904_s3 }
 0x327   :  { %p657_p1 = pnand %p655_p0, %p652_p13 }
 0x329   :  { %660 = shalt.err (!%p657_p1)
}
 0x32a   :  { %549 = dma.vmem_to_hbm [thread:$0]  %s544_s15, 4096, %s904_s3, [#allocation4], %s666_s22, %s666_s22, %s667_s23  }
 0x32b   :  { %663 = dma.done.wait [#allocation4], 4096  }
 0x32c   :  { %664 = vsyncadd [#allocation4], 4294963200 }
 0x32d   :  { %553 = vsyncpa [#allocation3], 1 }
 0x32e   :  { %554 = vsyncpa [#allocation4], 1 }

</bundles_post_ra>
